<compile_context>
chip_gen: v7x
topology: tpu7x:2x2x1
jax: 0.10.0
libtpu: 0.0.40
codegen_flags: <defaults>
</compile_context>

<pallas_src>
import jax
import jax.numpy as jnp
import numpy as np
from jax.experimental import pallas as pl
from jax.experimental.pallas import tpu as pltpu

# ---- problem sizes (match the PyTorch script) --------------------------------
BATCH = 2
D_K = 9
N_KV = 20
D_Q = 4
N_Q = 10
D_V = 7
N_HEADS = 4
N_HIDDEN = 32
D_HEAD = N_HIDDEN // N_HEADS          # 8

# ---- kernel tile layout -------------------------------------------------------
NQ_PAD = 16                           # queries padded to a sublane multiple
KV_SLOTS = 64                         # kv slots per batch (padded); batches stacked on lanes
SCORE_ROWS = BATCH * N_HEADS * NQ_PAD  # 128: rows  = (batch, head, query)
SCORE_LANES = BATCH * KV_SLOTS         # 128: lanes = (batch, kv slot)
O_ROWS = BATCH * NQ_PAD                # 32
O_LANES = 128                          # Wo output columns zero-padded to a full lane width


def _mha_kernel(q_ref, kT_ref, v_ref, wq_ref, wkT_ref, wv_ref, wo_ref,
                smask_ref, hmask_ref, a_ref, o_ref):
    f32 = jnp.float32
    bf16 = jnp.bfloat16

    # Q path (f32): the block-diagonal Wq already folds the per-head column masking
    # and the 1/sqrt(d_head) scale -> one MXU issue, zero VPU setup.
    q_bd = jnp.dot(q_ref[...], wq_ref[...], preferred_element_type=f32)      # (128, 32)

    # K path (f32): Kp^T = Wk^T @ K^T comes out directly as (32, 128); no XLU
    # transpose in front of the score matmul.
    kpT = jnp.dot(wkT_ref[...], kT_ref[...], preferred_element_type=f32)     # (32, 128)

    # All (batch, head, query) scores in ONE MXU issue, then kill cross-batch and
    # padded-kv lanes with the precomputed additive mask.
    s = jnp.dot(q_bd, kpT, preferred_element_type=f32) + smask_ref[...]      # (128, 128)

    # f32 softmax with exact normalization (A is user-visible).  Every row has at
    # least one valid key, so the -1e30 mask cannot produce a NaN row.
    m = jnp.max(s, axis=-1, keepdims=True)
    e = jnp.exp(s - m)
    a = e / jnp.sum(e, axis=-1, keepdims=True)
    a_ref[...] = a                               # single lane-dense (128, 128) store

    # V / output path: bf16 MXU operands, f32 accumulation.  Masked lanes of `a`
    # are exactly 0, so the shared kv-lane contraction cannot mix batches.
    vp = jnp.dot(v_ref[...], wv_ref[...], preferred_element_type=f32)        # (128, 32)
    o_heads = jnp.dot(a.astype(bf16), vp.astype(bf16),
                      preferred_element_type=f32)                            # (128, 32)
    o_heads = o_heads * hmask_ref[...]           # keep head h's own feature block

    # Concat-by-head == sum of the 4 head row blocks inside each batch block, then
    # the Wo projection (bf16 operands, lane-dense zero-padded Wo).  B == 2 is a
    # compile-time constant, so this loop is fully unrolled.
    for b in range(BATCH):
        blk = o_heads[b * N_HEADS * NQ_PAD:(b + 1) * N_HEADS * NQ_PAD]       # (64, 32)
        o_cat = (blk[0 * NQ_PAD:1 * NQ_PAD] + blk[1 * NQ_PAD:2 * NQ_PAD] +
                 blk[2 * NQ_PAD:3 * NQ_PAD] + blk[3 * NQ_PAD:4 * NQ_PAD])    # (16, 32)
        o_ref[b * NQ_PAD:(b + 1) * NQ_PAD, :] = jnp.dot(
            o_cat.astype(bf16), wo_ref[...], preferred_element_type=f32)     # (16, 128)

    # TODO(synk): the module's optional attention-mask argument (default mask=None)
    # is not implemented; only the padded-kv / cross-batch mask above is applied.


def prepare_params(wq, wk, wv, wo):
    """Weight / constant packing, hoisted out of the forward (run once at init)."""
    inv_scale = np.float32(1.0 / np.sqrt(D_HEAD))

    # Head-block-diagonal Wq with the 1/sqrt(d_head) scale folded in:
    #   wq_bd[h*d_q + f, c] = wq[f, c] * (c // d_head == h) / sqrt(d_head)
    col_head = np.arange(N_HIDDEN) // D_HEAD                              # (32,)
    head_sel = (np.arange(N_HEADS)[:, None] == col_head[None, :])         # (4, 32)
    wq_bd = (np.asarray(wq)[None, :, :] * head_sel[:, None, :] * inv_scale
             ).reshape(N_HEADS * D_Q, N_HIDDEN).astype(np.float32)        # (16, 32)

    wkT = jnp.asarray(np.asarray(wk).T, dtype=jnp.float32)                # (32, 9)
    wv_b = jnp.asarray(wv, dtype=jnp.bfloat16)                            # (7, 32)
    wo_pad = jnp.asarray(
        np.pad(np.asarray(wo), ((0, 0), (0, O_LANES - N_HIDDEN))),
        dtype=jnp.bfloat16)                                               # (32, 128)

    # Additive score mask: 0 where the lane belongs to the row's own batch AND a
    # real (non-padded) key, -1e30 elsewhere.
    rows = np.arange(SCORE_ROWS)
    lanes = np.arange(SCORE_LANES)
    same_batch = (rows[:, None] // (N_HEADS * NQ_PAD)) == (lanes[None, :] // KV_SLOTS)
    real_key = (lanes[None, :] % KV_SLOTS) < N_KV
    smask = jnp.asarray(np.where(same_batch & real_key, 0.0, -1e30),
                        dtype=jnp.float32)                                # (128, 128)

    # Head-ownership mask for the A@V output columns:
    #   hmask[(b*H + h)*16 + i, c] = (c // d_head == h)
    row_head = (rows // NQ_PAD) % N_HEADS
    hmask = jnp.asarray((row_head[:, None] == col_head[None, :]).astype(np.float32))

    return dict(wq_bd=jnp.asarray(wq_bd), wkT=wkT, wv=wv_b, wo=wo_pad,
                smask=smask, hmask=hmask)


def mha_forward(Q, K, V, params):
    """Fused MHA forward.  Returns (A, O) matching the PyTorch module:
       A: (B*n_heads, n_q, n_kv), O: (B, n_q, n_hidden)."""
    B, n_q, d_q = Q.shape
    _, n_kv, d_k = K.shape
    d_v = V.shape[-1]

    # --- per-call input plumbing (pad / replicate only, no compute) ----------
    # Q in the head-block pattern matching the block-diagonal Wq:
    #   q_in[(b*H + h)*16 + i, h*d_q + f] = Q[b, i, f]
    Qp = jnp.pad(Q, ((0, 0), (0, NQ_PAD - n_q), (0, 0)))                  # (B, 16, 4)
    eye_h = jnp.eye(N_HEADS, dtype=Q.dtype)
    q_in = (Qp[:, None, :, None, :] * eye_h[None, :, None, :, None]
            ).reshape(SCORE_ROWS, N_HEADS * d_q)                          # (128, 16)

    # K fed transposed, batches stacked on lanes: kT_in[f, b*64 + k] = K[b, k, f]
    Kp = jnp.pad(K, ((0, 0), (0, KV_SLOTS - n_kv), (0, 0)))               # (B, 64, 9)
    kT_in = jnp.transpose(Kp, (2, 0, 1)).reshape(d_k, SCORE_LANES)        # (9, 128)

    # V batches stacked on rows (kv-slot axis); bf16 for the MXU.
    Vp = jnp.pad(V, ((0, 0), (0, KV_SLOTS - n_kv), (0, 0)))               # (B, 64, 7)
    v_in = Vp.reshape(SCORE_LANES, d_v).astype(jnp.bfloat16)              # (128, 7)

    vmem = pl.BlockSpec(memory_space=pltpu.MemorySpace.VMEM)
    a_store, o_store = pl.pallas_call(
        _mha_kernel,
        in_specs=[vmem] * 9,
        out_specs=[vmem, vmem],
        out_shape=[
            jax.ShapeDtypeStruct((SCORE_ROWS, SCORE_LANES), jnp.float32),
            jax.ShapeDtypeStruct((O_ROWS, O_LANES), jnp.float32),
        ],
    )(q_in, kT_in, v_in, params["wq_bd"], params["wkT"], params["wv"],
      params["wo"], params["smask"], params["hmask"])

    # --- depad back to the module's shapes (layout plumbing only) ------------
    a4 = a_store.reshape(B, N_HEADS * NQ_PAD, B, KV_SLOTS)
    A = jnp.stack([a4[b, :, b, :] for b in range(B)], axis=0)             # (B, 64, 64)
    A = A.reshape(B, N_HEADS, NQ_PAD, KV_SLOTS)[:, :, :n_q, :n_kv]
    A = A.reshape(B * N_HEADS, n_q, n_kv)
    O = o_store[:, :N_HIDDEN].reshape(B, NQ_PAD, N_HIDDEN)[:, :n_q, :]
    return A, O


def _reference(Q, K, V, wq, wk, wv, wo):
    """Pure-JAX f32 reference mirroring the PyTorch forward."""
    B = Q.shape[0]
    Qp = Q @ wq
    Kp = K @ wk
    Vp = V @ wv

    def split_heads(X):  # transpose_qkv
        Bx, n, _ = X.shape
        X = X.reshape(Bx, n, N_HEADS, -1).transpose(0, 2, 1, 3)
        return X.reshape(Bx * N_HEADS, n, -1)

    Qh, Kh, Vh = split_heads(Qp), split_heads(Kp), split_heads(Vp)
    A = jnp.einsum("bqd,bkd->bqk", Qh, Kh) / jnp.sqrt(jnp.float32(D_HEAD))
    A = jax.nn.softmax(A, axis=-1)
    O = jnp.einsum("bqk,bkd->bqd", A, Vh)
    O = O.reshape(B, N_HEADS, O.shape[1], O.shape[2]).transpose(0, 2, 1, 3)
    O = O.reshape(B, O.shape[1], -1)
    O = O @ wo
    return A, O


if __name__ == "__main__":
    key = jax.random.PRNGKey(0)
    kq, kk, kv, kwq, kwk, kwv, kwo = jax.random.split(key, 7)

    Q = jax.random.normal(kq, (BATCH, N_Q, D_Q), dtype=jnp.float32)
    K = jax.random.normal(kk, (BATCH, N_KV, D_K), dtype=jnp.float32)
    V = jax.random.normal(kv, (BATCH, N_KV, D_V), dtype=jnp.float32)

    # Deterministic weight init, shape (d_in, d_out), scaled like nn.Linear.
    wq = jax.random.normal(kwq, (D_Q, N_HIDDEN), dtype=jnp.float32) / np.sqrt(D_Q)
    wk = jax.random.normal(kwk, (D_K, N_HIDDEN), dtype=jnp.float32) / np.sqrt(D_K)
    wv = jax.random.normal(kwv, (D_V, N_HIDDEN), dtype=jnp.float32) / np.sqrt(D_V)
    wo = jax.random.normal(kwo, (N_HIDDEN, N_HIDDEN), dtype=jnp.float32) / np.sqrt(N_HIDDEN)

    # Weight packing hoisted out of the forward (done once, not per call).
    params = prepare_params(wq, wk, wv, wo)

    fwd = jax.jit(mha_forward)
    A, O = fwd(Q, K, V, params)
    jax.block_until_ready((A, O))

    A_ref, O_ref = _reference(Q, K, V, wq, wk, wv, wo)
    # A path is all-f32 with exact normalization -> tight tolerance.
    np.testing.assert_allclose(np.asarray(A), np.asarray(A_ref), rtol=5e-3, atol=2e-3)
    # O path uses bf16 MXU operands (Vp projection, A@V, Wo) with f32 accumulation.
    np.testing.assert_allclose(np.asarray(O), np.asarray(O_ref), rtol=2e-2, atol=3e-2)

    print("KERNEL_OK")
</pallas_src>

<mosaic_0001>
module attributes {stable_mosaic.version = 11 : i64} {
  func.func @_mha_kernel(%arg0: memref<128x16xf32, #tpu.memory_space<vmem>>, %arg1: memref<9x128xf32, #tpu.memory_space<vmem>>, %arg2: memref<128x7xbf16, #tpu.memory_space<vmem>>, %arg3: memref<16x32xf32, #tpu.memory_space<vmem>>, %arg4: memref<32x9xf32, #tpu.memory_space<vmem>>, %arg5: memref<7x32xbf16, #tpu.memory_space<vmem>>, %arg6: memref<32x128xbf16, #tpu.memory_space<vmem>>, %arg7: memref<128x128xf32, #tpu.memory_space<vmem>>, %arg8: memref<128x32xf32, #tpu.memory_space<vmem>>, %arg9: memref<128x128xf32, #tpu.memory_space<vmem>>, %arg10: memref<32x128xf32, #tpu.memory_space<vmem>>) attributes {dimension_semantics = [], scalar_prefetch = 0 : i64, scratch_operands = 0 : i64, tpu.core_type = #tpu.core_type<tc>} {
    %c0 = arith.constant 0 : index
    %c0_0 = arith.constant 0 : index
    %0 = vector.load %arg0[%c0, %c0_0] : memref<128x16xf32, #tpu.memory_space<vmem>>, vector<128x16xf32>
    %c0_1 = arith.constant 0 : index
    %c0_2 = arith.constant 0 : index
    %1 = vector.load %arg3[%c0_1, %c0_2] : memref<16x32xf32, #tpu.memory_space<vmem>>, vector<16x32xf32>
    %cst = arith.constant dense<0.000000e+00> : vector<128x32xf32>
    %2 = tpu.matmul %0, %1, %cst {dimension_numbers = #tpu.dot_dimension_numbers<[1], [0], [0], [1], [0, 0, 1, 1], [], []>} : vector<128x16xf32>, vector<16x32xf32>, vector<128x32xf32> -> vector<128x32xf32>
    %c0_3 = arith.constant 0 : index
    %c0_4 = arith.constant 0 : index
    %3 = vector.load %arg4[%c0_3, %c0_4] : memref<32x9xf32, #tpu.memory_space<vmem>>, vector<32x9xf32>
    %c0_5 = arith.constant 0 : index
    %c0_6 = arith.constant 0 : index
    %4 = vector.load %arg1[%c0_5, %c0_6] : memref<9x128xf32, #tpu.memory_space<vmem>>, vector<9x128xf32>
    %cst_7 = arith.constant dense<0.000000e+00> : vector<32x128xf32>
    %5 = tpu.matmul %3, %4, %cst_7 {dimension_numbers = #tpu.dot_dimension_numbers<[1], [0], [0], [1], [0, 0, 1, 1], [], []>} : vector<32x9xf32>, vector<9x128xf32>, vector<32x128xf32> -> vector<32x128xf32>
    %cst_8 = arith.constant dense<0.000000e+00> : vector<128x128xf32>
    %6 = tpu.matmul %2, %5, %cst_8 {dimension_numbers = #tpu.dot_dimension_numbers<[1], [0], [0], [1], [0, 0, 1, 1], [], []>} : vector<128x32xf32>, vector<32x128xf32>, vector<128x128xf32> -> vector<128x128xf32>
    %c0_9 = arith.constant 0 : index
    %c0_10 = arith.constant 0 : index
    %7 = vector.load %arg7[%c0_9, %c0_10] : memref<128x128xf32, #tpu.memory_space<vmem>>, vector<128x128xf32>
    %8 = arith.addf %6, %7 : vector<128x128xf32>
    %cst_11 = arith.constant dense<0xFF800000> : vector<128xf32>
    %9 = vector.multi_reduction <maximumf>, %8, %cst_11 [1] : vector<128x128xf32> to vector<128xf32>
    %10 = vector.shape_cast %9 : vector<128xf32> to vector<128x1xf32>
    %11 = vector.broadcast %10 : vector<128x1xf32> to vector<128x128xf32>
    %12 = arith.subf %8, %11 : vector<128x128xf32>
    %13 = math.exp %12 : vector<128x128xf32>
    %cst_12 = arith.constant dense<0.000000e+00> : vector<128xf32>
    %14 = vector.multi_reduction <add>, %13, %cst_12 [1] : vector<128x128xf32> to vector<128xf32>
    %15 = vector.shape_cast %14 : vector<128xf32> to vector<128x1xf32>
    %16 = vector.broadcast %15 : vector<128x1xf32> to vector<128x128xf32>
    %17 = arith.divf %13, %16 : vector<128x128xf32>
    %c0_13 = arith.constant 0 : index
    %c0_14 = arith.constant 0 : index
    %18 = vector.load %arg9[%c0_13, %c0_14] : memref<128x128xf32, #tpu.memory_space<vmem>>, vector<128x128xf32>
    tpu.vector_store %arg9[%c0_13, %c0_14], %17 {strides = array<i32>} : memref<128x128xf32, #tpu.memory_space<vmem>>, vector<128x128xf32>,
    %c0_15 = arith.constant 0 : index
    %c0_16 = arith.constant 0 : index
    %19 = vector.load %arg2[%c0_15, %c0_16] : memref<128x7xbf16, #tpu.memory_space<vmem>>, vector<128x7xbf16>
    %c0_17 = arith.constant 0 : index
    %c0_18 = arith.constant 0 : index
    %20 = vector.load %arg5[%c0_17, %c0_18] : memref<7x32xbf16, #tpu.memory_space<vmem>>, vector<7x32xbf16>
    %cst_19 = arith.constant dense<0.000000e+00> : vector<128x32xf32>
    %21 = tpu.matmul %19, %20, %cst_19 {dimension_numbers = #tpu.dot_dimension_numbers<[1], [0], [0], [1], [0, 0, 1, 1], [], []>} : vector<128x7xbf16>, vector<7x32xbf16>, vector<128x32xf32> -> vector<128x32xf32>
    %22 = arith.truncf %17 : vector<128x128xf32> to vector<128x128xbf16>
    %23 = arith.truncf %21 : vector<128x32xf32> to vector<128x32xbf16>
    %cst_20 = arith.constant dense<0.000000e+00> : vector<128x32xf32>
    %24 = tpu.matmul %22, %23, %cst_20 {dimension_numbers = #tpu.dot_dimension_numbers<[1], [0], [0], [1], [0, 0, 1, 1], [], []>} : vector<128x128xbf16>, vector<128x32xbf16>, vector<128x32xf32> -> vector<128x32xf32>
    %c0_21 = arith.constant 0 : index
    %c0_22 = arith.constant 0 : index
    %25 = vector.load %arg8[%c0_21, %c0_22] : memref<128x32xf32, #tpu.memory_space<vmem>>, vector<128x32xf32>
    %26 = arith.mulf %24, %25 : vector<128x32xf32>
    %27 = vector.extract_strided_slice %26 {offsets = [0, 0], sizes = [64, 32], strides = [1, 1]} : vector<128x32xf32> to vector<64x32xf32>
    %28 = vector.extract_strided_slice %27 {offsets = [0, 0], sizes = [16, 32], strides = [1, 1]} : vector<64x32xf32> to vector<16x32xf32>
    %29 = vector.extract_strided_slice %27 {offsets = [16, 0], sizes = [16, 32], strides = [1, 1]} : vector<64x32xf32> to vector<16x32xf32>
    %30 = arith.addf %28, %29 : vector<16x32xf32>
    %31 = vector.extract_strided_slice %27 {offsets = [32, 0], sizes = [16, 32], strides = [1, 1]} : vector<64x32xf32> to vector<16x32xf32>
    %32 = arith.addf %30, %31 : vector<16x32xf32>
    %33 = vector.extract_strided_slice %27 {offsets = [48, 0], sizes = [16, 32], strides = [1, 1]} : vector<64x32xf32> to vector<16x32xf32>
    %34 = arith.addf %32, %33 : vector<16x32xf32>
    %35 = arith.truncf %34 : vector<16x32xf32> to vector<16x32xbf16>
    %c0_23 = arith.constant 0 : index
    %c0_24 = arith.constant 0 : index
    %36 = vector.load %arg6[%c0_23, %c0_24] : memref<32x128xbf16, #tpu.memory_space<vmem>>, vector<32x128xbf16>
    %cst_25 = arith.constant dense<0.000000e+00> : vector<16x128xf32>
    %37 = tpu.matmul %35, %36, %cst_25 {dimension_numbers = #tpu.dot_dimension_numbers<[1], [0], [0], [1], [0, 0, 1, 1], [], []>} : vector<16x32xbf16>, vector<32x128xbf16>, vector<16x128xf32> -> vector<16x128xf32>
    %c0_26 = arith.constant 0 : index
    %c0_27 = arith.constant 0 : index
    %38 = vector.load %arg10[%c0_26, %c0_27] : memref<32x128xf32, #tpu.memory_space<vmem>>, vector<16x128xf32>
    tpu.vector_store %arg10[%c0_26, %c0_27], %37 {strides = array<i32>} : memref<32x128xf32, #tpu.memory_space<vmem>>, vector<16x128xf32>,
    %39 = vector.extract_strided_slice %26 {offsets = [64, 0], sizes = [64, 32], strides = [1, 1]} : vector<128x32xf32> to vector<64x32xf32>
    %40 = vector.extract_strided_slice %39 {offsets = [0, 0], sizes = [16, 32], strides = [1, 1]} : vector<64x32xf32> to vector<16x32xf32>
    %41 = vector.extract_strided_slice %39 {offsets = [16, 0], sizes = [16, 32], strides = [1, 1]} : vector<64x32xf32> to vector<16x32xf32>
    %42 = arith.addf %40, %41 : vector<16x32xf32>
    %43 = vector.extract_strided_slice %39 {offsets = [32, 0], sizes = [16, 32], strides = [1, 1]} : vector<64x32xf32> to vector<16x32xf32>
    %44 = arith.addf %42, %43 : vector<16x32xf32>
    %45 = vector.extract_strided_slice %39 {offsets = [48, 0], sizes = [16, 32], strides = [1, 1]} : vector<64x32xf32> to vector<16x32xf32>
    %46 = arith.addf %44, %45 : vector<16x32xf32>
    %47 = arith.truncf %46 : vector<16x32xf32> to vector<16x32xbf16>
    %c0_28 = arith.constant 0 : index
    %c0_29 = arith.constant 0 : index
    %48 = vector.load %arg6[%c0_28, %c0_29] : memref<32x128xbf16, #tpu.memory_space<vmem>>, vector<32x128xbf16>
    %cst_30 = arith.constant dense<0.000000e+00> : vector<16x128xf32>
    %49 = tpu.matmul %47, %48, %cst_30 {dimension_numbers = #tpu.dot_dimension_numbers<[1], [0], [0], [1], [0, 0, 1, 1], [], []>} : vector<16x32xbf16>, vector<32x128xbf16>, vector<16x128xf32> -> vector<16x128xf32>
    %c16 = arith.constant 16 : index
    %c0_31 = arith.constant 0 : index
    %50 = vector.load %arg10[%c16, %c0_31] : memref<32x128xf32, #tpu.memory_space<vmem>>, vector<16x128xf32>
    tpu.vector_store %arg10[%c16, %c0_31], %49 {strides = array<i32>} : memref<32x128xf32, #tpu.memory_space<vmem>>, vector<16x128xf32>,
    return
  }
}

</mosaic_0001>

<bundles_post_ra>
// kernel: mha_forward.1
= control target key start
LH: loop header
LB: loop body
LE: loop exit
PB: predicated region body
PF: predicated region fallthrough
CT: control target
= control target key end

     0   :  { %vm53_vm0 = vcmask 130048   ;;  %vm266_vm1 = vcmask 1040384   ;;  %vm1572_vm2 = vmmov 1   ;;  %vm253_vm4 = vcmask 72704   ;;  %s2088_s3 = inlined_call_operand.vmem [shape: f32[16,32], index: 3, kind: input, shape index: {}]   ;;  %s2089_s0 = inlined_call_operand.vmem [shape: f32[128,16], index: 0, kind: input, shape index: {}]   ;;  %s2090_s1 = inlined_call_operand.vmem [shape: f32[9,128], index: 1, kind: input, shape index: {}]   ;;  %s2091_s4 = inlined_call_operand.vmem [shape: f32[32,9], index: 4, kind: input, shape index: {}]   ;;  %s2092_s5 = inlined_call_operand.vmem [shape: bf16[7,32], index: 5, kind: input, shape index: {}]   ;;  %s2093_s2 = inlined_call_operand.vmem [shape: bf16[128,7], index: 2, kind: input, shape index: {}]   ;;  %s2094_s7 = inlined_call_operand.vmem [shape: f32[128,128], index: 7, kind: input, shape index: {}]   ;;  %s2095_s6 = inlined_call_operand.vmem [shape: bf16[32,128], index: 6, kind: input, shape index: {}]   ;;  %s2096_s9 = inlined_call_operand.vmem [shape: f32[128,128], index: 9, kind: output, shape index: {0}]   ;;  %s2097_s8 = inlined_call_operand.vmem [shape: f32[128,32], index: 8, kind: input, shape index: {}]   ;;  %s2098_s10 = inlined_call_operand.vmem [shape: f32[32,128], index: 10, kind: output, shape index: {1}]  }
   0x1   :  { %v51_v0 = vld [vmem:[%s2088_s3] sm:$0xff]  ;;  %v52_v1 = vld [vmem:[%s2088_s3 + $0x8] sm:$0xff]  ;;  %v49_v2 = vld [vmem:[%s2089_s0 + $0x70] sm:$0xff]  ;;  %vm371_vm5 = vcmask 261120   ;;  %vm807_vm6 = vcmask 1042432   ;;  %vm808_vm7 = vcmask 1043456  }
   0x2   :  { %v1472_v3 = vpack.c.bf16 %v52_v1, %v51_v0  ;;  %1361 = vmatprep.mubr.msk.f32.mxu1 %vm53_vm0, %v49_v2  ;;  %v251_v4 = vld [vmem:[%s2090_s1] sm:$0xff]  ;;  %v252_v5 = vld [vmem:[%s2090_s1 + $0x8] sm:$0x1]  ;;  %vm1647_vm3 = vmpackc.low %vm266_vm1, %vm1572_vm2  ;;  %vm782_vm8 = vcmask 56320   ;;  %v1573_v50 = vmov 65535   ;;  %vm1575_vm9 = vmmov 0  }
   0x3   :  { %v1476_v6 = vpack.c.bf16 %v252_v5, %v251_v4  ;;  %v35_v8 = vld [vmem:[%s2089_s0] sm:$0xff]  ;;  %v50_v9 = vld [vmem:[%s2089_s0 + $0x78] sm:$0xff]  ;;  %v36_v10 = vld [vmem:[%s2089_s0 + $0x8] sm:$0xff]  ;;  %v809_v51 = vsel %vm807_vm6, 4294967295, %v1573_v50 }
   0x4   :  { %1490 = vmatprep.subr.bf16.mxu1 %v1472_v3  ;;  %1473 = vmatprep.subr.bf16.mxu0 %v1472_v3  ;;  %v247_v11 = vld [vmem:[%s2091_s4] sm:$0xff]  ;;  %v37_v12 = vld [vmem:[%s2089_s0 + $0x10] sm:$0xff]  ;;  %v248_v13 = vld [vmem:[%s2091_s4 + $0x8] sm:$0xff]  ;;  %v810_v53 = vsel %vm808_vm7, %v809_v51, 0 }
   0x5   :  { %1491 = vmatpush3.bf16.msra.mxu1 %v1472_v3  ;;  %1475 = vmatpush3.bf16.msra.mxu0 %v1472_v3  ;;  %v38_v14 = vld [vmem:[%s2089_s0 + $0x18] sm:$0xff]  ;;  %v249_v15 = vld [vmem:[%s2091_s4 + $0x10] sm:$0xff]  ;;  %v39_v16 = vld [vmem:[%s2089_s0 + $0x20] sm:$0xff] }
   0x6   :  { %1478 = vmatprep.subr.msk.bf16.mxu1 %vm1647_vm3, %v1476_v6  ;;  %1340 = vmatprep.mubr.msk.f32.mxu0 %vm53_vm0, %v35_v8  ;;  %v250_v17 = vld [vmem:[%s2091_s4 + $0x18] sm:$0xff]  ;;  %v40_v18 = vld [vmem:[%s2089_s0 + $0x28] sm:$0xff]  ;;  %v41_v19 = vld [vmem:[%s2089_s0 + $0x30] sm:$0xff] }
   0x7   :  { %v42_v20 = vld [vmem:[%s2089_s0 + $0x38] sm:$0xff]  ;;  %v43_v21 = vld [vmem:[%s2089_s0 + $0x40] sm:$0xff]  ;;  %v44_v22 = vld [vmem:[%s2089_s0 + $0x48] sm:$0xff] }
   0x8   :  { %1362 = vmatmul.mubr.msk.f32.vlgmr.msra.gmra.mrb[0].mxu1 %vm53_vm0, %v50_v9  ;;  %1341 = vmatmul.mubr.msk.f32.vlgmr.msra.gmra.mrb[0].mxu0 %vm53_vm0, %v36_v10  ;;  %v45_v23 = vld [vmem:[%s2089_s0 + $0x50] sm:$0xff]  ;;  %v46_v24 = vld [vmem:[%s2089_s0 + $0x58] sm:$0xff]  ;;  %v47_v25 = vld [vmem:[%s2089_s0 + $0x60] sm:$0xff] }
   0x9   :  { %1481 = vmatpush3.bf16.msk.msra.mxu1 %vm1647_vm3, %v1476_v6  ;;  %1368 = vmatprep.mubr.msk.f32.mxu1 %vm253_vm4, %v247_v11  ;;  %v48_v26 = vld [vmem:[%s2089_s0 + $0x68] sm:$0xff]  ;;  %v741_v49 = vld [vmem:[%s2092_s5] sm:$0xf]  ;;  %v1498_v56 = vld [vmem:[%s2093_s2 + $0x10] sm:$0xff]  }
   0xa   :  { %1343 = vmatprep.mubr.msk.f32.mxu0 %vm53_vm0, %v37_v12  ;;  %v1496_v52 = vld [vmem:[%s2093_s2] sm:$0xff]   ;;  %v812_v54 = vand.u32 %v810_v53, %v741_v49  ;;  %v1497_v55 = vld [vmem:[%s2093_s2 + $0x8] sm:$0xff]   ;;  %v1499_v57 = vld [vmem:[%s2093_s2 + $0x18] sm:$0xff]  }
   0xb   :  { %v1500_v58 = vld [vmem:[%s2093_s2 + $0x20] sm:$0xff]   ;;  %v1501_v59 = vld [vmem:[%s2093_s2 + $0x28] sm:$0xff]   ;;  %v1502_v60 = vld [vmem:[%s2093_s2 + $0x30] sm:$0xff]  }
   0xc   :  { %1369 = vmatmul.mubr.msk.f32.vlgmr.msra.gmra.mrb[2].mxu1 %vm253_vm4, %v248_v13  ;;  %1344 = vmatmul.mubr.msk.f32.gmra.mrb[2].mxu0 %vm53_vm0, %v38_v14  ;;  %v1503_v61 = vld [vmem:[%s2093_s2 + $0x38] sm:$0xff]   ;;  %v355_v62 = vld [vmem:[%s2094_s7] sm:$0xff]  ;;  %v356_v3 = vld [vmem:[%s2094_s7 + $0x8] sm:$0xff] }
   0xd   :  { %1371 = vmatprep.mubr.msk.f32.mxu1 %vm253_vm4, %v249_v15  ;;  %1346 = vmatprep.mubr.msk.f32.mxu0 %vm53_vm0, %v39_v16  ;;  %v358_v2 = vld [vmem:[%s2094_s7 + $0x18] sm:$0xff]  ;;  %v357_v8 = vld [vmem:[%s2094_s7 + $0x10] sm:$0xff]  ;;  %v359_v9 = vld [vmem:[%s2094_s7 + $0x20] sm:$0xff] }
   0xe   :  { %1406 = vmatprep.subr.bf16.mxu0 %v812_v54  ;;  %v360_v13 = vld [vmem:[%s2094_s7 + $0x28] sm:$0xff]  ;;  %v361_v15 = vld [vmem:[%s2094_s7 + $0x30] sm:$0xff] }
   0xf   :  { %1407 = vmatpush3.bf16.msra.mxu0 %v812_v54 }
  0x10   :  { %1372 = vmatmul.mubr.msk.f32.gmra.mrb[4].mxu1 %vm253_vm4, %v250_v17  ;;  %1347 = vmatmul.mubr.msk.f32.gmra.mrb[4].mxu0 %vm53_vm0, %v40_v18 }
  0x11   :  { %1349 = vmatprep.mubr.msk.f32.mxu0 %vm53_vm0, %v41_v19  ;;  %v362_v19 = vld [vmem:[%s2094_s7 + $0x38] sm:$0xff] }
  0x14   :  { %1350 = vmatmul.mubr.msk.f32.gmra.mrb[6].mxu0 %vm53_vm0, %v42_v20 }
  0x15   :  { %1352 = vmatprep.mubr.msk.f32.mxu0 %vm53_vm0, %v43_v21  ;;  %v363_v21 = vld [vmem:[%s2094_s7 + $0x40] sm:$0xff] }
  0x18   :  { %1353 = vmatmul.mubr.msk.f32.gmra.mrb[8].mxu0 %vm53_vm0, %v44_v22 }
  0x19   :  { %1355 = vmatprep.mubr.msk.f32.mxu0 %vm53_vm0, %v45_v23 }
  0x1c   :  { %1356 = vmatmul.mubr.msk.f32.gmra.mrb[10].mxu0 %vm53_vm0, %v46_v24 }
  0x1d   :  { %1358 = vmatprep.mubr.msk.f32.mxu0 %vm53_vm0, %v47_v25  ;;  %v364_v25 = vld [vmem:[%s2094_s7 + $0x48] sm:$0xff] }
  0x20   :  { %1359 = vmatmul.mubr.msk.f32.gmra.mrb[12].mxu0 %vm53_vm0, %v48_v26 }
  0x21   :  { %1408 = vmatprep.mubr.msk.bf16.mxu0 %vm782_vm8, %v1496_v52 }
  0x24   :  { %1409 = vmatmul.mubr.msk.bf16.vlgmr.msra.gmra.mrb[16].mxu0 %vm782_vm8, %v1497_v55 }
  0x25   :  { %1412 = vmatprep.mubr.msk.bf16.mxu0 %vm782_vm8, %v1498_v56 }
  0x2c   :  { %1413 = vmatmul.mubr.msk.bf16.gmra.mrb[20].mxu0 %vm782_vm8, %v1499_v57 }
  0x2d   :  { %1416 = vmatprep.mubr.msk.bf16.mxu0 %vm782_vm8, %v1500_v58 }
  0x34   :  { %1417 = vmatmul.mubr.msk.bf16.gmra.mrb[24].mxu0 %vm782_vm8, %v1501_v59 }
  0x35   :  { %1420 = vmatprep.mubr.msk.bf16.mxu0 %vm782_vm8, %v1502_v60 }
  0x3c   :  { %1421 = vmatmul.mubr.msk.bf16.gmra.mrb[28].mxu0 %vm782_vm8, %v1503_v61 }
  0xdb   :  { %v1363_v27 = vpop.f32.mrb[0].mxu1  ;;  %v1342_v28 = vpop.f32.mrb[0].mxu0 }
  0xdc   :  { %v238_v29 = vpop.f32.mrb[1].mxu1  ;;  %v168_v30 = vpop.f32.mrb[1].mxu0 }
  0xdd   :  { %1382 = vmatprep.mubr.msk.f32.mxu1 %vm371_vm5, %v168_v30 }
  0xdf   :  { %v1370_v31 = vpop.f32.mrb[2].mxu1  ;;  %v1345_v32 = vpop.f32.mrb[2].mxu0 }
  0xe0   :  { %v336_v33 = vpop.f32.mrb[3].mxu1  ;;  %v178_v34 = vpop.f32.mrb[3].mxu0 }
  0xe1   :  { %v1482_v35 = vpack.c.bf16 %v1370_v31, %v336_v33  ;;  %v366_v31 = vld [vmem:[%s2094_s7 + $0x58] sm:$0xff]  ;;  %v367_v33 = vld [vmem:[%s2094_s7 + $0x60] sm:$0xff] }
  0xe3   :  { %v1373_v36 = vpop.f32.mrb[4].mxu1  ;;  %1483 = vmatprep.subr.bf16.mxu1 %v1482_v35  ;;  %v1348_v37 = vpop.f32.mrb[4].mxu0 }
  0xe4   :  { %v346_v38 = vpop.f32.mrb[5].mxu1  ;;  %1485 = vmatpush3.bf16.msra.mxu1 %v1482_v35  ;;  %v188_v39 = vpop.f32.mrb[5].mxu0 }
  0xe5   :  { %v1486_v40 = vpack.c.bf16 %v1373_v36, %v346_v38 }
  0xe7   :  { %1487 = vmatprep.subr.bf16.mxu1 %v1486_v40  ;;  %v1351_v41 = vpop.f32.mrb[6].mxu0 }
  0xe8   :  { %1489 = vmatpush3.bf16.msra.mxu1 %v1486_v40  ;;  %v198_v42 = vpop.f32.mrb[7].mxu0 }
  0xeb   :  { %1383 = vmatmul.mubr.msk.f32.vlgmr.msra.gmra.mrb[6].mxu1 %vm371_vm5, %v1342_v28  ;;  %v1354_v43 = vpop.f32.mrb[8].mxu0 }
  0xec   :  { %1385 = vmatprep.mubr.msk.f32.mxu1 %vm371_vm5, %v178_v34  ;;  %v208_v44 = vpop.f32.mrb[9].mxu0 }
  0xef   :  { %1386 = vmatmul.mubr.msk.f32.gmra.mrb[8].mxu1 %vm371_vm5, %v1345_v32  ;;  %v1357_v45 = vpop.f32.mrb[10].mxu0 }
  0xf0   :  { %1388 = vmatprep.mubr.msk.f32.mxu1 %vm371_vm5, %v188_v39  ;;  %v218_v46 = vpop.f32.mrb[11].mxu0  ;;  %v369_v39 = vld [vmem:[%s2094_s7 + $0x70] sm:$0xff] }
  0xf3   :  { %1389 = vmatmul.mubr.msk.f32.gmra.mrb[10].mxu1 %vm371_vm5, %v1348_v37  ;;  %v1360_v47 = vpop.f32.mrb[12].mxu0  ;;  %v368_v37 = vld [vmem:[%s2094_s7 + $0x68] sm:$0xff] }
  0xf4   :  { %1391 = vmatprep.mubr.msk.f32.mxu1 %vm371_vm5, %v198_v42  ;;  %v228_v48 = vpop.f32.mrb[13].mxu0 }
  0xf7   :  { %1392 = vmatmul.mubr.msk.f32.gmra.mrb[12].mxu1 %vm371_vm5, %v1351_v41 }
  0xf8   :  { %1394 = vmatprep.mubr.msk.f32.mxu1 %vm371_vm5, %v208_v44 }
  0xfb   :  { %1395 = vmatmul.mubr.msk.f32.gmra.mrb[14].mxu1 %vm371_vm5, %v1354_v43  ;;  %v370_v43 = vld [vmem:[%s2094_s7 + $0x78] sm:$0xff] }
  0xfc   :  { %1397 = vmatprep.mubr.msk.f32.mxu1 %vm371_vm5, %v218_v46  ;;  %v1410_v46 = vpop.f32.mrb[16].mxu0 }
  0xff   :  { %1398 = vmatmul.mubr.msk.f32.gmra.mrb[16].mxu1 %vm371_vm5, %v1357_v45 }
 0x100   :  { %1400 = vmatprep.mubr.msk.f32.mxu1 %vm371_vm5, %v228_v48 }
 0x103   :  { %1401 = vmatmul.mubr.msk.f32.gmra.mrb[18].mxu1 %vm371_vm5, %v1360_v47  ;;  %v848_v47 = vpop.f32.mrb[17].mxu0 }
 0x104   :  { %1403 = vmatprep.mubr.msk.f32.mxu1 %vm371_vm5, %v238_v29  ;;  %v1411_v48 = vpop.f32.mrb[18].mxu0 }
 0x105   :  { %v920_v49 = vpack.c.bf16 %v1411_v48, %v1410_v46  ;;  %v851_v50 = vpop.f32.mrb[19].mxu0 }
 0x106   :  { %v919_v51 = vpack.c.bf16 %v851_v50, %v848_v47  ;;  %v1414_v52 = vpop.f32.mrb[20].mxu0 }
 0x107   :  { %1404 = vmatmul.mubr.msk.f32.gmra.mrb[20].mxu1 %vm371_vm5, %v1363_v27  ;;  %v365_v27 = vld [vmem:[%s2094_s7 + $0x50] sm:$0xff]  ;;  %v864_v53 = vpop.f32.mrb[21].mxu0 }
 0x108   :  { %1424 = vmatprep.subr.bf16.mxu1 %v919_v51  ;;  %v1415_v54 = vpop.f32.mrb[22].mxu0 }
 0x109   :  { %1425 = vmatpush3.bf16.msra.mxu1 %v919_v51  ;;  %v922_v55 = vpack.c.bf16 %v1415_v54, %v1414_v52  ;;  %v867_v56 = vpop.f32.mrb[23].mxu0 }
 0x10a   :  { %1426 = vmatprep.subr.bf16.mxu1 %v920_v49  ;;  %v921_v57 = vpack.c.bf16 %v867_v56, %v864_v53  ;;  %v1418_v58 = vpop.f32.mrb[24].mxu0 }
 0x10b   :  { %v880_v59 = vpop.f32.mrb[25].mxu0 }
 0x10c   :  { %v1419_v61 = vpop.f32.mrb[26].mxu0 }
 0x10d   :  { %1427 = vmatpush3.bf16.msra.mxu1 %v920_v49 }
 0x10e   :  { %1428 = vmatprep.subr.bf16.mxu1 %v921_v57 }
 0x111   :  { %1429 = vmatpush3.bf16.msra.mxu1 %v921_v57 }
 0x112   :  { %1430 = vmatprep.subr.bf16.mxu1 %v922_v55 }
 0x115   :  { %1431 = vmatpush3.bf16.msra.mxu1 %v922_v55 }
 0x1be   :  { %v1384_v63 = vpop.f32.mrb[6].mxu1 }
 0x1bf   :  { %v486_v0 = vpop.f32.mrb[7].mxu1  ;;  %v1796_v7 = vadd.f32 %v1384_v63, %v356_v3  ;;  %v924_v63 = vpack.c.bf16 %v1419_v61, %v1418_v58 }
 0x1c0   :  { %v1785_v1 = vadd.f32 %v486_v0, %v355_v62  ;;  %v883_v0 = vpop.f32.mrb[27].mxu0 }
 0x1c1   :  { %v1422_v55 = vpop.f32.mrb[28].mxu0 }
 0x1c2   :  { %565 = vmax.xlane.f32.xlu0 %v1785_v1  ;;  %v1387_v4 = vpop.f32.mrb[8].mxu1  ;;  %v896_v58 = vpop.f32.mrb[29].mxu0 }
 0x1c3   :  { %v1794_v5 = vadd.f32 %v1387_v4, %v358_v2  ;;  %v496_v6 = vpop.f32.mrb[9].mxu1  ;;  %v923_v2 = vpack.c.bf16 %v883_v0, %v880_v59  ;;  %v1423_v59 = vpop.f32.mrb[30].mxu0 }
 0x1c4   :  { %v1806_v11 = vadd.f32 %v496_v6, %v357_v8  ;;  %v926_v61 = vpack.c.bf16 %v1423_v59, %v1422_v55 }
 0x1c5   :  { %571 = vmax.xlane.f32.xlu1 %v1794_v5  ;;  %1432 = vmatprep.subr.bf16.mxu1 %v923_v2 }
 0x1c6   :  { %567 = vmax.xlane.f32.xlu0 %v1796_v7  ;;  %v1390_v10 = vpop.f32.mrb[10].mxu1  ;;  %1433 = vmatpush3.bf16.msra.mxu1 %v923_v2 }
 0x1c7   :  { %v506_v12 = vpop.f32.mrb[11].mxu1  ;;  %v1818_v17 = vadd.f32 %v1390_v10, %v360_v13  ;;  %1434 = vmatprep.subr.bf16.mxu1 %v924_v63 }
 0x1c8   :  { %v1811_v14 = vadd.f32 %v506_v12, %v359_v9 }
 0x1c9   :  { %569 = vmax.xlane.f32.xlu1 %v1806_v11 }
 0x1ca   :  { %573 = vmax.xlane.f32.xlu0 %v1811_v14  ;;  %v1393_v16 = vpop.f32.mrb[12].mxu1  ;;  %1435 = vmatpush3.bf16.msra.mxu1 %v924_v63  ;;  %v899_v63 = vpop.f32.mrb[31].mxu0 }
 0x1cb   :  { %v516_v18 = vpop.f32.mrb[13].mxu1  ;;  %v1830_v23 = vadd.f32 %v1393_v16, %v362_v19  ;;  %v925_v0 = vpack.c.bf16 %v899_v63, %v896_v58 }
 0x1cc   :  { %v1823_v20 = vadd.f32 %v516_v18, %v361_v15 }
 0x1cd   :  { %575 = vmax.xlane.f32.xlu1 %v1818_v17  ;;  %1436 = vmatprep.subr.bf16.mxu1 %v925_v0 }
 0x1ce   :  { %577 = vmax.xlane.f32.xlu0 %v1823_v20  ;;  %v1396_v22 = vpop.f32.mrb[14].mxu1  ;;  %1437 = vmatpush3.bf16.msra.mxu1 %v925_v0 }
 0x1cf   :  { %v526_v24 = vpop.f32.mrb[15].mxu1  ;;  %v1842_v29 = vadd.f32 %v1396_v22, %v364_v25  ;;  %1438 = vmatprep.subr.bf16.mxu1 %v926_v61 }
 0x1d0   :  { %v1835_v26 = vadd.f32 %v526_v24, %v363_v21 }
 0x1d1   :  { %579 = vmax.xlane.f32.xlu1 %v1830_v23 }
 0x1d2   :  { %581 = vmax.xlane.f32.xlu0 %v1835_v26  ;;  %v1399_v28 = vpop.f32.mrb[16].mxu1  ;;  %1439 = vmatpush3.bf16.msra.mxu1 %v926_v61 }
 0x1d3   :  { %v536_v30 = vpop.f32.mrb[17].mxu1  ;;  %v1854_v35 = vadd.f32 %v1399_v28, %v366_v31 }
 0x1d4   :  { %v1847_v32 = vadd.f32 %v536_v30, %v365_v27 }
 0x1d5   :  { %583 = vmax.xlane.f32.xlu1 %v1842_v29 }
 0x1d6   :  { %585 = vmax.xlane.f32.xlu0 %v1847_v32  ;;  %v1402_v34 = vpop.f32.mrb[18].mxu1 }
 0x1d7   :  { %v546_v36 = vpop.f32.mrb[19].mxu1  ;;  %v1866_v41 = vadd.f32 %v1402_v34, %v368_v37 }
 0x1d8   :  { %v1859_v38 = vadd.f32 %v546_v36, %v367_v33 }
 0x1d9   :  { %587 = vmax.xlane.f32.xlu1 %v1854_v35 }
 0x1da   :  { %v1405_v40 = vpop.f32.mrb[20].mxu1  ;;  %589 = vmax.xlane.f32.xlu0 %v1859_v38 }
 0x1db   :  { %v556_v42 = vpop.f32.mrb[21].mxu1  ;;  %v1875_v45 = vadd.f32 %v1405_v40, %v370_v43 }
 0x1dc   :  { %v1871_v44 = vadd.f32 %v556_v42, %v369_v39 }
 0x1dd   :  { %591 = vmax.xlane.f32.xlu1 %v1866_v41 }
 0x1de   :  { %593 = vmax.xlane.f32.xlu0 %v1871_v44 }
 0x1e1   :  { %595 = vmax.xlane.f32.xlu1 %v1875_v45 }
 0x24f   :  { %v566_v60 = vpop.xlane.xlu0 %565 }
 0x250   :  { %v597_v62 = vsub.f32 %v1785_v1, %v566_v60 }
 0x252   :  { %v613_v3 = vmul.f32 1.442695, %v597_v62  ;;  %v572_v4 = vpop.xlane.xlu1 %571 }
 0x253   :  { %v568_v6 = vpop.xlane.xlu0 %567  ;;  %v600_v8 = vsub.f32 %v1794_v5, %v572_v4 }
 0x254   :  { %1508 = vpow2.f32 %v613_v3  ;;  %v598_v9 = vsub.f32 %v1796_v7, %v568_v6 }
 0x255   :  { %v619_v15 = vmul.f32 1.442695, %v600_v8 }
 0x256   :  { %v615_v10 = vmul.f32 1.442695, %v598_v9  ;;  %v570_v12 = vpop.xlane.xlu1 %569  ;;  %v1574_v9 = vmov 0.0  }
 0x257   :  { %v599_v13 = vsub.f32 %v1806_v11, %v570_v12  ;;  %v574_v1 = vpop.xlane.xlu0 %573  ;;  %1456 = vmatprep.subr.bf16.mxu0 %v1574_v9  ;;  %1460 = vmatprep.mubr.msk.bf16.mxu0 %vm1575_vm9, %v1574_v9 }
 0x258   :  { %1510 = vpow2.f32 %v615_v10  ;;  %v601_v16 = vsub.f32 %v1811_v14, %v574_v1  ;;  %v1504_v10 = vld [vmem:[%s2095_s6] sm:$0xff]  }
 0x259   :  { %v617_v18 = vmul.f32 1.442695, %v599_v13  ;;  %1457 = vmatpush3.bf16.msra.mxu0 %v1504_v10 }
 0x25a   :  { %v621_v19 = vmul.f32 1.442695, %v601_v16  ;;  %v576_v21 = vpop.xlane.xlu1 %575  ;;  %1458 = vmatprep.subr.bf16.mxu0 %v1574_v9 }
 0x25b   :  { %1512 = vpow2.f32 %v617_v18  ;;  %v602_v5 = vsub.f32 %v1818_v17, %v576_v21  ;;  %v578_v22 = vpop.xlane.xlu0 %577 }
 0x25c   :  { %1514 = vpow2.f32 %v619_v15  ;;  %v603_v7 = vsub.f32 %v1823_v20, %v578_v22 }
 0x25d   :  { %v623_v24 = vmul.f32 1.442695, %v602_v5  ;;  %1516 = vpow2.f32 %v621_v19 }
 0x25e   :  { %v1885_v25 = vpop.eup %1508  ;;  %v625_v11 = vmul.f32 1.442695, %v603_v7  ;;  %v580_v27 = vpop.xlane.xlu1 %579 }
 0x25f   :  { %1518 = vpow2.f32 %v623_v24  ;;  %v604_v14 = vsub.f32 %v1830_v23, %v580_v27  ;;  %v582_v28 = vpop.xlane.xlu0 %581  ;;  %645 = vadd.xlane.f32.xlu0 %v1885_v25 }
 0x260   :  { %v605_v30 = vsub.f32 %v1835_v26, %v582_v28  ;;  %1520 = vpow2.f32 %v625_v11 }
 0x261   :  { %v627_v31 = vmul.f32 1.442695, %v604_v14 }
 0x262   :  { %v1890_v17 = vpop.eup %1510  ;;  %v629_v33 = vmul.f32 1.442695, %v605_v30  ;;  %v584_v20 = vpop.xlane.xlu1 %583 }
 0x263   :  { %1522 = vpow2.f32 %v627_v31  ;;  %v606_v34 = vsub.f32 %v1842_v29, %v584_v20  ;;  %v586_v36 = vpop.xlane.xlu0 %585  ;;  %647 = vadd.xlane.f32.xlu1 %v1890_v17 }
 0x264   :  { %v607_v37 = vsub.f32 %v1847_v32, %v586_v36  ;;  %1524 = vpow2.f32 %v629_v33 }
 0x265   :  { %v1895_v23 = vpop.eup %1512  ;;  %v631_v39 = vmul.f32 1.442695, %v606_v34 }
 0x266   :  { %v1897_v40 = vpop.eup %1514  ;;  %v633_v26 = vmul.f32 1.442695, %v607_v37  ;;  %v588_v42 = vpop.xlane.xlu1 %587  ;;  %649 = vadd.xlane.f32.xlu0 %v1895_v23 }
 0x267   :  { %1526 = vpow2.f32 %v631_v39  ;;  %v608_v43 = vsub.f32 %v1854_v35, %v588_v42  ;;  %651 = vadd.xlane.f32.xlu1 %v1897_v40  ;;  %v590_v29 = vpop.xlane.xlu0 %589  ;;  %v1902_v46 = vpop.eup %1516 }
 0x268   :  { %v609_v32 = vsub.f32 %v1859_v38, %v590_v29  ;;  %1528 = vpow2.f32 %v633_v26 }
 0x269   :  { %v1905_v47 = vpop.eup %1518  ;;  %v635_v48 = vmul.f32 1.442695, %v608_v43 }
 0x26a   :  { %v637_v49 = vmul.f32 1.442695, %v609_v32  ;;  %v592_v50 = vpop.xlane.xlu1 %591  ;;  %653 = vadd.xlane.f32.xlu0 %v1902_v46  ;;  %v1910_v52 = vpop.eup %1520 }
 0x26b   :  { %1530 = vpow2.f32 %v635_v48  ;;  %v610_v51 = vsub.f32 %v1866_v41, %v592_v50  ;;  %655 = vadd.xlane.f32.xlu1 %v1905_v47  ;;  %v594_v35 = vpop.xlane.xlu0 %593 }
 0x26c   :  { %v611_v53 = vsub.f32 %v1871_v44, %v594_v35  ;;  %1532 = vpow2.f32 %v637_v49 }
 0x26d   :  { %v1913_v54 = vpop.eup %1522  ;;  %v639_v38 = vmul.f32 1.442695, %v610_v51 }
 0x26e   :  { %v641_v56 = vmul.f32 1.442695, %v611_v53  ;;  %v596_v57 = vpop.xlane.xlu1 %595  ;;  %657 = vadd.xlane.f32.xlu0 %v1910_v52  ;;  %v1918_v60 = vpop.eup %1524 }
 0x26f   :  { %1534 = vpow2.f32 %v639_v38  ;;  %v612_v41 = vsub.f32 %v1875_v45, %v596_v57  ;;  %659 = vadd.xlane.f32.xlu1 %v1913_v54 }
 0x270   :  { %1536 = vpow2.f32 %v641_v56 }
 0x271   :  { %v1920_v44 = vpop.eup %1526  ;;  %v643_v62 = vmul.f32 1.442695, %v612_v41 }
 0x272   :  { %661 = vadd.xlane.f32.xlu0 %v1918_v60  ;;  %v1924_v2 = vpop.eup %1528 }
 0x273   :  { %1538 = vpow2.f32 %v643_v62  ;;  %663 = vadd.xlane.f32.xlu1 %v1920_v44 }
 0x275   :  { %v1926_v45 = vpop.eup %1530 }
 0x276   :  { %665 = vadd.xlane.f32.xlu0 %v1924_v2  ;;  %v1930_v3 = vpop.eup %1532 }
 0x277   :  { %667 = vadd.xlane.f32.xlu1 %v1926_v45 }
 0x279   :  { %v1932_v4 = vpop.eup %1534 }
 0x27a   :  { %669 = vadd.xlane.f32.xlu0 %v1930_v3  ;;  %v1936_v6 = vpop.eup %1536 }
 0x27b   :  { %671 = vadd.xlane.f32.xlu1 %v1932_v4 }
 0x27d   :  { %v1938_v8 = vpop.eup %1538 }
 0x27e   :  { %673 = vadd.xlane.f32.xlu0 %v1936_v6 }
 0x27f   :  { %675 = vadd.xlane.f32.xlu1 %v1938_v8 }
 0x2ec   :  { %v646_v12 = vpop.xlane.xlu0 %645 }
 0x2ed   :  { %1540 = vrcp.f32 %v646_v12  ;;  %v1025_v12 = vld [vmem:[%s2097_s8 + $0x8] sm:$0xff] }
 0x2f0   :  { %v648_v13 = vpop.xlane.xlu1 %647 }
 0x2f1   :  { %1542 = vrcp.f32 %v648_v13 }
 0x2f3   :  { %v650_v1 = vpop.xlane.xlu0 %649 }
 0x2f4   :  { %1544 = vrcp.f32 %v650_v1  ;;  %v652_v15 = vpop.xlane.xlu1 %651 }
 0x2f5   :  { %1546 = vrcp.f32 %v652_v15 }
 0x2f7   :  { %v1541_v16 = vpop.eup %1540  ;;  %v654_v18 = vpop.xlane.xlu0 %653 }
 0x2f8   :  { %1548 = vrcp.f32 %v654_v18  ;;  %v656_v19 = vpop.xlane.xlu1 %655  ;;  %v678_v21 = vmul.f32 %v1541_v16, %v1885_v25 }
 0x2f9   :  { %1550 = vrcp.f32 %v656_v19 }
 0x2fa   :  { %709 = vst [vmem:[%s2096_s9] sm:$0xff] %v678_v21 }
 0x2fb   :  { %v1543_v5 = vpop.eup %1542  ;;  %v658_v22 = vpop.xlane.xlu0 %657 }
 0x2fc   :  { %1552 = vrcp.f32 %v658_v22  ;;  %v660_v7 = vpop.xlane.xlu1 %659  ;;  %v680_v24 = vmul.f32 %v1543_v5, %v1890_v17  ;;  %v1028_v5 = vld [vmem:[%s2097_s8 + $0x20] sm:$0xff] }
 0x2fd   :  { %1554 = vrcp.f32 %v660_v7  ;;  %v1030_v7 = vld [vmem:[%s2097_s8 + $0x30] sm:$0xff] }
 0x2fe   :  { %v1545_v11 = vpop.eup %1544  ;;  %710 = vst [vmem:[%s2096_s9 + $0x8] sm:$0xff] %v680_v24  ;;  %v911_v27 = vpack.c.bf16 %v680_v24, %v678_v21 }
 0x2ff   :  { %v1547_v14 = vpop.eup %1546  ;;  %v682_v25 = vmul.f32 %v1545_v11, %v1895_v23  ;;  %v662_v28 = vpop.xlane.xlu0 %661  ;;  %v1029_v11 = vld [vmem:[%s2097_s8 + $0x28] sm:$0xff] }
 0x300   :  { %v684_v30 = vmul.f32 %v1547_v14, %v1897_v40  ;;  %1556 = vrcp.f32 %v662_v28  ;;  %v664_v31 = vpop.xlane.xlu1 %663  ;;  %1440 = vmatprep.mubr.bf16.mxu1 %v911_v27 }
 0x301   :  { %711 = vst [vmem:[%s2096_s9 + $0x10] sm:$0xff] %v682_v25  ;;  %1558 = vrcp.f32 %v664_v31 }
 0x302   :  { %v1549_v17 = vpop.eup %1548  ;;  %712 = vst [vmem:[%s2096_s9 + $0x18] sm:$0xff] %v684_v30  ;;  %v912_v33 = vpack.c.bf16 %v684_v30, %v682_v25  ;;  %v1031_v25 = vld [vmem:[%s2097_s8 + $0x38] sm:$0xff] }
 0x303   :  { %v1551_v20 = vpop.eup %1550  ;;  %v666_v34 = vpop.xlane.xlu0 %665  ;;  %v686_v36 = vmul.f32 %v1549_v17, %v1902_v46 }
 0x304   :  { %1560 = vrcp.f32 %v666_v34  ;;  %v668_v37 = vpop.xlane.xlu1 %667  ;;  %1441 = vmatmul.mubr.bf16.vlgmr.msra.gmra.mrb[24].mxu1 %v912_v33  ;;  %v688_v23 = vmul.f32 %v1551_v20, %v1905_v47 }
 0x305   :  { %1562 = vrcp.f32 %v668_v37  ;;  %713 = vst [vmem:[%s2096_s9 + $0x20] sm:$0xff] %v686_v36  ;;  %v1032_v37 = vld [vmem:[%s2097_s8 + $0x40] sm:$0xff] }
 0x306   :  { %v1553_v39 = vpop.eup %1552  ;;  %714 = vst [vmem:[%s2096_s9 + $0x28] sm:$0xff] %v688_v23  ;;  %v913_v40 = vpack.c.bf16 %v688_v23, %v686_v36  ;;  %v1034_v36 = vld [vmem:[%s2097_s8 + $0x50] sm:$0xff] }
 0x307   :  { %v1555_v26 = vpop.eup %1554  ;;  %v670_v42 = vpop.xlane.xlu0 %669  ;;  %v690_v43 = vmul.f32 %v1553_v39, %v1910_v52 }
 0x308   :  { %1564 = vrcp.f32 %v670_v42  ;;  %v672_v29 = vpop.xlane.xlu1 %671  ;;  %1444 = vmatprep.mubr.bf16.mxu1 %v913_v40  ;;  %v692_v46 = vmul.f32 %v1555_v26, %v1913_v54  ;;  %v1035_v40 = vld [vmem:[%s2097_s8 + $0x58] sm:$0xff] }
 0x309   :  { %1566 = vrcp.f32 %v672_v29  ;;  %715 = vst [vmem:[%s2096_s9 + $0x30] sm:$0xff] %v690_v43  ;;  %v1506_v29 = vld [vmem:[%s2095_s6] sm:$0xff]  }
 0x30a   :  { %v1557_v32 = vpop.eup %1556  ;;  %716 = vst [vmem:[%s2096_s9 + $0x38] sm:$0xff] %v692_v46  ;;  %v914_v47 = vpack.c.bf16 %v692_v46, %v690_v43  ;;  %v1033_v43 = vld [vmem:[%s2097_s8 + $0x48] sm:$0xff] }
 0x30b   :  { %v1559_v48 = vpop.eup %1558  ;;  %v674_v49 = vpop.xlane.xlu0 %673  ;;  %v694_v50 = vmul.f32 %v1557_v32, %v1918_v60 }
 0x30c   :  { %1568 = vrcp.f32 %v674_v49  ;;  %v676_v51 = vpop.xlane.xlu1 %675  ;;  %1445 = vmatmul.mubr.bf16.gmra.mrb[28].mxu1 %v914_v47  ;;  %v696_v35 = vmul.f32 %v1559_v48, %v1920_v44 }
 0x30d   :  { %1570 = vrcp.f32 %v676_v51  ;;  %717 = vst [vmem:[%s2096_s9 + $0x40] sm:$0xff] %v694_v50 }
 0x30e   :  { %v1561_v52 = vpop.eup %1560  ;;  %718 = vst [vmem:[%s2096_s9 + $0x48] sm:$0xff] %v696_v35  ;;  %v915_v53 = vpack.c.bf16 %v696_v35, %v694_v50  ;;  %v1507_v35 = vld [vmem:[%s2095_s6 + $0x8] sm:$0xff]  }
 0x30f   :  { %v1563_v54 = vpop.eup %1562  ;;  %v698_v38 = vmul.f32 %v1561_v52, %v1924_v2  ;;  %v1505_v2 = vld [vmem:[%s2095_s6 + $0x8] sm:$0xff]  }
 0x310   :  { %1448 = vmatprep.mubr.bf16.mxu1 %v915_v53  ;;  %v700_v55 = vmul.f32 %v1563_v54, %v1926_v45  ;;  %1459 = vmatpush3.bf16.msra.mxu0 %v1505_v2  ;;  %v1026_v45 = vld [vmem:[%s2097_s8 + $0x10] sm:$0xff]  ;;  %v1036_v53 = vld [vmem:[%s2097_s8 + $0x60] sm:$0xff] }
 0x311   :  { %719 = vst [vmem:[%s2096_s9 + $0x50] sm:$0xff] %v698_v38  ;;  %1464 = vmatprep.subr.bf16.mxu0 %v1574_v9 }
 0x312   :  { %v1565_v56 = vpop.eup %1564  ;;  %720 = vst [vmem:[%s2096_s9 + $0x58] sm:$0xff] %v700_v55  ;;  %v916_v57 = vpack.c.bf16 %v700_v55, %v698_v38  ;;  %v1038_v38 = vld [vmem:[%s2097_s8 + $0x70] sm:$0xff] }
 0x313   :  { %v1567_v58 = vpop.eup %1566  ;;  %v702_v41 = vmul.f32 %v1565_v56, %v1930_v3  ;;  %v1024_v3 = vld [vmem:[%s2097_s8] sm:$0xff]  ;;  %v1037_v56 = vld [vmem:[%s2097_s8 + $0x68] sm:$0xff] }
 0x314   :  { %1449 = vmatmul.mubr.bf16.gmra.mrb[32].mxu1 %v916_v57  ;;  %v704_v59 = vmul.f32 %v1567_v58, %v1932_v4 }
 0x315   :  { %721 = vst [vmem:[%s2096_s9 + $0x60] sm:$0xff] %v702_v41 }
 0x316   :  { %v1569_v60 = vpop.eup %1568  ;;  %722 = vst [vmem:[%s2096_s9 + $0x68] sm:$0xff] %v704_v59  ;;  %v917_v61 = vpack.c.bf16 %v704_v59, %v702_v41 }
 0x317   :  { %v1571_v44 = vpop.eup %1570  ;;  %v706_v62 = vmul.f32 %v1569_v60, %v1936_v6  ;;  %v1027_v6 = vld [vmem:[%s2097_s8 + $0x18] sm:$0xff] }
 0x318   :  { %1452 = vmatprep.mubr.bf16.mxu1 %v917_v61  ;;  %v708_v63 = vmul.f32 %v1571_v44, %v1938_v8 }
 0x319   :  { %723 = vst [vmem:[%s2096_s9 + $0x70] sm:$0xff] %v706_v62 }
 0x31a   :  { %724 = vst [vmem:[%s2096_s9 + $0x78] sm:$0xff] %v708_v63  ;;  %v918_v0 = vpack.c.bf16 %v708_v63, %v706_v62 }
 0x31c   :  { %1453 = vmatmul.mubr.bf16.gmra.mrb[36].mxu1 %v918_v0 }
 0x3d7   :  { %v1442_v4 = vpop.f32.mrb[24].mxu1 }
 0x3d8   :  { %v1042_v8 = vmul.f32 %v1442_v4, %v1026_v45  ;;  %v961_v10 = vpop.f32.mrb[25].mxu1 }
 0x3d9   :  { %v1040_v13 = vmul.f32 %v1024_v3, %v961_v10  ;;  %v1443_v1 = vpop.f32.mrb[26].mxu1 }
 0x3da   :  { %v1043_v15 = vmul.f32 %v1443_v1, %v1027_v6  ;;  %v964_v16 = vpop.f32.mrb[27].mxu1 }
 0x3db   :  { %v1056_v18 = vadd.f32 %v1042_v8, %v1040_v13  ;;  %v1041_v19 = vmul.f32 %v1025_v12, %v964_v16 }
 0x3dd   :  { %v1057_v21 = vadd.f32 %v1043_v15, %v1041_v19 }
 0x3df   :  { %v1446_v22 = vpop.f32.mrb[28].mxu1 }
 0x3e0   :  { %v977_v24 = vpop.f32.mrb[29].mxu1  ;;  %v1046_v30 = vmul.f32 %v1446_v22, %v1030_v7 }
 0x3e1   :  { %v1044_v27 = vmul.f32 %v1028_v5, %v977_v24  ;;  %v1447_v14 = vpop.f32.mrb[30].mxu1 }
 0x3e2   :  { %v980_v28 = vpop.f32.mrb[31].mxu1  ;;  %v1047_v20 = vmul.f32 %v1447_v14, %v1031_v25 }
 0x3e3   :  { %v1058_v31 = vadd.f32 %v1056_v18, %v1044_v27  ;;  %v1045_v17 = vmul.f32 %v1029_v11, %v980_v28 }
 0x3e5   :  { %v1060_v33 = vadd.f32 %v1058_v31, %v1046_v30  ;;  %v1059_v34 = vadd.f32 %v1057_v21, %v1045_v17 }
 0x3e7   :  { %v1061_v23 = vadd.f32 %v1059_v34, %v1047_v20  ;;  %v1450_v39 = vpop.f32.mrb[32].mxu1 }
 0x3e8   :  { %v1050_v26 = vmul.f32 %v1450_v39, %v1034_v36  ;;  %v993_v42 = vpop.f32.mrb[33].mxu1 }
 0x3e9   :  { %v1062_v46 = vpack.c.bf16 %v1061_v23, %v1060_v33  ;;  %v1048_v32 = vmul.f32 %v1032_v37, %v993_v42  ;;  %v1451_v47 = vpop.f32.mrb[34].mxu1 }
 0x3ea   :  { %v1051_v48 = vmul.f32 %v1451_v47, %v1035_v40  ;;  %v996_v49 = vpop.f32.mrb[35].mxu1 }
 0x3eb   :  { %v1125_v50 = vadd.f32 %v1050_v26, %v1048_v32  ;;  %v1049_v51 = vmul.f32 %v1033_v43, %v996_v49  ;;  %1461 = vmatmul.mubr.msk.bf16.vlgmr.msra.gmra.mrb[32].mxu0 %vm371_vm5, %v1062_v46 }
 0x3ec   :  { %1465 = vmatpush3.bf16.msra.mxu0 %v1506_v29  ;;  %1468 = vmatprep.mubr.msk.bf16.mxu0 %vm1575_vm9, %v1574_v9 }
 0x3ed   :  { %v1126_v52 = vadd.f32 %v1051_v48, %v1049_v51  ;;  %1466 = vmatprep.subr.bf16.mxu0 %v1574_v9  ;;  %v1039_v9 = vld [vmem:[%s2097_s8 + $0x78] sm:$0xff] }
 0x3ef   :  { %v1454_v54 = vpop.f32.mrb[36].mxu1 }
 0x3f0   :  { %v1009_v55 = vpop.f32.mrb[37].mxu1  ;;  %1467 = vmatpush3.bf16.msra.mxu0 %v1507_v35  ;;  %v1054_v59 = vmul.f32 %v1454_v54, %v1038_v38 }
 0x3f1   :  { %v1052_v57 = vmul.f32 %v1036_v53, %v1009_v55  ;;  %v1455_v58 = vpop.f32.mrb[38].mxu1 }
 0x3f2   :  { %v1012_v41 = vpop.f32.mrb[39].mxu1  ;;  %v1055_v62 = vmul.f32 %v1455_v58, %v1039_v9 }
 0x3f3   :  { %v1127_v60 = vadd.f32 %v1125_v50, %v1052_v57  ;;  %v1053_v61 = vmul.f32 %v1037_v56, %v1012_v41 }
 0x3f5   :  { %v1129_v44 = vadd.f32 %v1127_v60, %v1054_v59  ;;  %v1128_v63 = vadd.f32 %v1126_v52, %v1053_v61 }
 0x3f7   :  { %v1130_v0 = vadd.f32 %v1128_v63, %v1055_v62 }
 0x3f9   :  { %v1131_v2 = vpack.c.bf16 %v1130_v0, %v1129_v44 }
 0x3fb   :  { %1469 = vmatmul.mubr.msk.bf16.vlgmr.msra.gmra.mrb[36].mxu0 %vm371_vm5, %v1131_v2 }
 0x4be   :  { %v1116_v45 = vpop.f32.mrb[32].mxu0 }
 0x4bf   :  { %1123 = vst [vmem:[%s2098_s10] sm:$0xff] %v1116_v45  ;;  %v1462_v3 = vpop.f32.mrb[33].mxu0 }
 0x4c0   :  { %v1119_v4 = vpop.f32.mrb[34].mxu0 }
 0x4c1   :  { %1124 = vst [vmem:[%s2098_s10 + $0x8] sm:$0xff] %v1119_v4  ;;  %v1463_v6 = vpop.f32.mrb[35].mxu0 }
 0x4ce   :  { %v1185_v8 = vpop.f32.mrb[36].mxu0 }
 0x4cf   :  { %1192 = vst [vmem:[%s2098_s10 + $0x10] sm:$0xff] %v1185_v8  ;;  %v1470_v10 = vpop.f32.mrb[37].mxu0 }
 0x4d0   :  { %v1188_v12 = vpop.f32.mrb[38].mxu0 }
 0x4d1   :  { %1193 = vst [vmem:[%s2098_s10 + $0x18] sm:$0xff] %v1188_v12  ;;  %v1471_v13 = vpop.f32.mrb[39].mxu0 }

</bundles_post_ra>
